<compile_context>
chip_gen: v6e
topology: v6e:2x2x1
jax: 0.10.0
libtpu: 0.0.40
codegen_flags: <defaults>
</compile_context>

<pallas_src>
import math

import jax
import jax.numpy as jnp
from jax.experimental import pallas as pl
from jax.experimental.pallas import tpu as pltpu


_LANE = 128
_NEG_BIG = -1.0e4        # exp(-1e4 + sim/tau) underflows to exactly 0.0 in f32
_SINGLE_STEP_MAX = 512   # collapse the whole grid to one program up to this n_pad


def _round_up(a, b):
    return (a + b - 1) // b * b


def _device_kind():
    try:
        return jax.devices()[0].device_kind.lower()
    except Exception:  # pragma: no cover - defensive only
        return ""


def _pow2_tile(upper, target):
    """Largest power-of-two multiple of 128 that is <= min(upper, target)."""
    t = _LANE
    while t * 2 <= min(upper, target):
        t *= 2
    return t


def _block_top_down(lhs_ref, rhs_ref, yrow_ref, ycol_ref):
    """Shared per-tile body.

    lhs_ref : (TM, Dp) bf16  rows L2-normalized, scaled by 1/tau, plus a 1.0
              column that carries the folded -1/tau shift.
    rhs_ref : (Dp, TN) bf16  L2-normalized keys (pre-transposed, lane-dense)
              plus a shift row (-1/tau real cols, -1e4 padded cols).
    """
    logits = jnp.dot(lhs_ref[...], rhs_ref[...],
                     preferred_element_type=jnp.float32)          # (TM, TN)
    e = jnp.exp(logits)                 # <= 1.0 by construction; pad cols -> 0
    same = (yrow_ref[...] == ycol_ref[...]).astype(jnp.float32)   # (TM, TN)
    top = jnp.sum(e * same, axis=1, keepdims=True)
    down = jnp.sum(e, axis=1, keepdims=True)
    return top, down


def _single_step_kernel(lhs_ref, rhs_ref, yrow_ref, ycol_ref, out_ref):
    # Whole problem in one program: no accumulators, no grid branches.
    top, down = _block_top_down(lhs_ref, rhs_ref, yrow_ref, ycol_ref)
    out_ref[...] = jnp.log(down) - jnp.log(top)


def _tiled_kernel(lhs_ref, rhs_ref, yrow_ref, ycol_ref, out_ref,
                  top_acc, down_acc):
    j = pl.program_id(1)

    @pl.when(j == 0)
    def _():
        top_acc[...] = jnp.zeros_like(top_acc)
        down_acc[...] = jnp.zeros_like(down_acc)

    top, down = _block_top_down(lhs_ref, rhs_ref, yrow_ref, ycol_ref)
    top_acc[...] += top
    down_acc[...] += down

    @pl.when(j == pl.num_programs(1) - 1)
    def _():
        # -log(top/down) = log(down) - log(top)
        out_ref[...] = jnp.log(down_acc[...]) - jnp.log(top_acc[...])


def contrastive_loss(x, y, fp_v=None, tau=0.1, tm=None, tn=None):
    """Pallas TPU implementation of Contrastiveloss.forward(x, y, fp_v)."""
    del fp_v  # accepted but unused, matching the PyTorch forward
    N, D = x.shape
    x = x.astype(jnp.float32)
    inv_tau = 1.0 / float(tau)

    # Normalize rows once (O(N*D)); zero-norm rows give inf/nan like PyTorch.
    xn = x * jax.lax.rsqrt(jnp.sum(x * x, axis=1, keepdims=True))

    kind = _device_kind()
    is_v7 = "v7" in kind
    is_v5e = ("v5" in kind) and ("lite" in kind or "v5e" in kind)
    vmem_cap = (48 if is_v7 else 96) * 1024 * 1024

    n_pad0 = _round_up(N, _LANE)

    # ---- tile selection -------------------------------------------------
    if tm is None and tn is None and n_pad0 <= _SINGLE_STEP_MAX:
        single = True
        tm = tn = n_pad0
    else:
        single = False
        if tn is None:
            tn = _pow2_tile(n_pad0, 256)
        else:
            tn = _round_up(int(tn), _LANE)
        if tm is None:
            target_tm = 256 if is_v5e else (512 if is_v7 else 1024)
            tm = _pow2_tile(n_pad0, target_tm)
            if is_v7 and (n_pad0 // tm) < 2 and tm > _LANE:
                tm //= 2  # make the parallel row axis span both TensorCores
        else:
            tm = _round_up(int(tm), _LANE)

    n_pad = _round_up(n_pad0, tm * tn // math.gcd(tm, tn))
    pad = n_pad - N

    # ---- operand construction (shift & padding folded into the matmul) ---
    d_pad = _round_up(D + 1, 16)  # +1 shift column; 16 keeps bf16 sublanes packed

    # lhs: [ xn / tau | 1.0 | 0 ... ]   (padded rows keep the 1.0 column)
    lhs = jnp.zeros((n_pad, d_pad), jnp.float32)
    lhs = lhs.at[:N, :D].set(xn * inv_tau)
    lhs = lhs.at[:, D].set(1.0)
    lhs = lhs.astype(jnp.bfloat16)

    # rhs: [ xn.T ; shift_row ; 0 ... ]  pre-transposed -> lane-dense key tiles.
    col_shift = jnp.where(jnp.arange(n_pad) < N, -inv_tau, _NEG_BIG)
    rhs = jnp.zeros((d_pad, n_pad), jnp.float32)
    rhs = rhs.at[:D, :N].set(xn.T)
    rhs = rhs.at[D, :].set(col_shift)
    rhs = rhs.astype(jnp.bfloat16)

    y32 = y.astype(jnp.int32).reshape(N)
    y_row = jnp.pad(y32, (0, pad), constant_values=-1).reshape(n_pad, 1)
    y_col = jnp.pad(y32, (0, pad), constant_values=-2).reshape(1, n_pad)

    row_blocks = n_pad // tm
    cost = pl.CostEstimate(
        flops=2 * n_pad * n_pad * d_pad,
        transcendentals=n_pad * n_pad,
        bytes_accessed=(n_pad * d_pad * 2                    # lhs streamed once
                        + n_pad * d_pad * 2 * row_blocks     # rhs per row block
                        + 2 * n_pad * 4 + n_pad * 4),        # labels + output
    )

    if single:
        out = pl.pallas_call(
            _single_step_kernel,
            out_shape=jax.ShapeDtypeStruct((n_pad, 1), jnp.float32),
            grid_spec=pltpu.PrefetchScalarGridSpec(
                num_scalar_prefetch=0,
                grid=(1,),
                in_specs=[
                    pl.BlockSpec((n_pad, d_pad), lambda i: (0, 0)),
                    pl.BlockSpec((d_pad, n_pad), lambda i: (0, 0)),
                    pl.BlockSpec((n_pad, 1), lambda i: (0, 0)),
                    pl.BlockSpec((1, n_pad), lambda i: (0, 0)),
                ],
                out_specs=pl.BlockSpec((n_pad, 1), lambda i: (0, 0)),
            ),
            compiler_params=pltpu.CompilerParams(
                dimension_semantics=("arbitrary",),
                vmem_limit_bytes=vmem_cap,
            ),
            cost_estimate=cost,
        )(lhs, rhs, y_row, y_col)
    else:
        grid = (n_pad // tm, n_pad // tn)
        out = pl.pallas_call(
            _tiled_kernel,
            out_shape=jax.ShapeDtypeStruct((n_pad, 1), jnp.float32),
            grid_spec=pltpu.PrefetchScalarGridSpec(
                num_scalar_prefetch=0,
                grid=grid,
                in_specs=[
                    pl.BlockSpec((tm, d_pad), lambda i, j: (i, 0)),  # query rows
                    pl.BlockSpec((d_pad, tn), lambda i, j: (0, j)),  # key cols
                    pl.BlockSpec((tm, 1), lambda i, j: (i, 0)),      # row labels
                    pl.BlockSpec((1, tn), lambda i, j: (0, j)),      # col labels
                ],
                out_specs=pl.BlockSpec((tm, 1), lambda i, j: (i, 0)),
                scratch_shapes=[pltpu.VMEM((tm, 1), jnp.float32),
                                pltpu.VMEM((tm, 1), jnp.float32)],
            ),
            compiler_params=pltpu.CompilerParams(
                dimension_semantics=("parallel", "arbitrary"),
                vmem_limit_bytes=vmem_cap,
            ),
            cost_estimate=cost,
        )(lhs, rhs, y_row, y_col)

    # Mean over the real rows only (padded rows carry +inf and are sliced away).
    return jnp.mean(out[:N, 0])


def _reference_loss(x, y, tau=0.1):
    # Pure-JAX f32 reference mirroring the PyTorch loops.
    norms = jnp.linalg.norm(x, axis=1, keepdims=True)
    sim = (x @ x.T) / (norms * norms.T)
    e = jnp.exp(sim / tau)
    mask = y[:, None] == y[None, :]
    top = jnp.sum(jnp.where(mask, e, 0.0), axis=1)
    down = jnp.sum(e, axis=1)
    return jnp.mean(-jnp.log(top / down))


if __name__ == "__main__":
    key = jax.random.PRNGKey(0)
    kx, ky, kx2, ky2 = jax.random.split(key, 4)

    # Small case matching the module's real usage (batch of 8, hidden=32):
    # exercises the collapsed single-program kernel.
    N, D = 8, 32
    x = jax.random.normal(kx, (N, D), dtype=jnp.float32)
    y = jax.random.randint(ky, (N,), 0, 3, dtype=jnp.int32)
    fp_v = jnp.zeros((N,), dtype=jnp.float32)        # accepted but unused

    loss = jax.block_until_ready(contrastive_loss(x, y, fp_v, tau=0.1))
    ref = _reference_loss(x, y, tau=0.1)
    assert jnp.allclose(loss, ref, rtol=5e-2, atol=2e-4), (loss, ref)

    # Larger case forced onto the tiled accumulator kernel: multiple row and
    # column blocks plus padding (N not a multiple of 128).
    N2, D2 = 200, 32
    x2 = jax.random.normal(kx2, (N2, D2), dtype=jnp.float32)
    y2 = jax.random.randint(ky2, (N2,), 0, 4, dtype=jnp.int32)
    loss2 = jax.block_until_ready(
        contrastive_loss(x2, y2, None, tau=0.1, tm=128, tn=128))
    ref2 = _reference_loss(x2, y2, tau=0.1)
    assert jnp.allclose(loss2, ref2, rtol=5e-2, atol=5e-4), (loss2, ref2)

    print("KERNEL_OK")
</pallas_src>

<mosaic_0001>
module attributes {stable_mosaic.version = 11 : i64} {
  func.func @_single_step_kernel(%arg0: i32, %arg1: memref<128x48xbf16, #tpu.memory_space<vmem>>, %arg2: memref<48x128xbf16, #tpu.memory_space<vmem>>, %arg3: memref<128x1xi32, #tpu.memory_space<vmem>>, %arg4: memref<1x128xi32, #tpu.memory_space<vmem>>, %arg5: memref<128x1xf32, #tpu.memory_space<vmem>>) attributes {dimension_semantics = [#tpu.dimension_semantics<arbitrary>], iteration_bounds = array<i64: 1>, scalar_prefetch = 0 : i64, scratch_operands = 0 : i64, tpu.core_type = #tpu.core_type<tc>, window_params = [{pipeline_mode = #tpu.pipeline_mode<synchronous>, transform_indices = @transform_0, window_bounds = array<i64: 128, 48>}, {pipeline_mode = #tpu.pipeline_mode<synchronous>, transform_indices = @transform_1, window_bounds = array<i64: 48, 128>}, {pipeline_mode = #tpu.pipeline_mode<synchronous>, transform_indices = @transform_2, window_bounds = array<i64: 128, 1>}, {pipeline_mode = #tpu.pipeline_mode<synchronous>, transform_indices = @transform_3, window_bounds = array<i64: 1, 128>}, {pipeline_mode = #tpu.pipeline_mode<synchronous>, transform_indices = @transform_4, window_bounds = array<i64: 128, 1>}]} {
    %c0 = arith.constant 0 : index
    %c0_0 = arith.constant 0 : index
    %0 = vector.load %arg1[%c0, %c0_0] : memref<128x48xbf16, #tpu.memory_space<vmem>>, vector<128x48xbf16>
    %c0_1 = arith.constant 0 : index
    %c0_2 = arith.constant 0 : index
    %1 = vector.load %arg2[%c0_1, %c0_2] : memref<48x128xbf16, #tpu.memory_space<vmem>>, vector<48x128xbf16>
    %cst = arith.constant dense<0.000000e+00> : vector<128x128xf32>
    %2 = tpu.matmul %0, %1, %cst {dimension_numbers = #tpu.dot_dimension_numbers<[1], [0], [0], [1], [0, 0, 1, 1], [], []>} : vector<128x48xbf16>, vector<48x128xbf16>, vector<128x128xf32> -> vector<128x128xf32>
    %3 = math.exp %2 : vector<128x128xf32>
    %c0_3 = arith.constant 0 : index
    %c0_4 = arith.constant 0 : index
    %4 = vector.load %arg3[%c0_3, %c0_4] : memref<128x1xi32, #tpu.memory_space<vmem>>, vector<128x1xi32>
    %c0_5 = arith.constant 0 : index
    %c0_6 = arith.constant 0 : index
    %5 = vector.load %arg4[%c0_5, %c0_6] : memref<1x128xi32, #tpu.memory_space<vmem>>, vector<1x128xi32>
    %6 = vector.broadcast %4 : vector<128x1xi32> to vector<128x128xi32>
    %7 = vector.broadcast %5 : vector<1x128xi32> to vector<128x128xi32>
    %8 = arith.cmpi eq, %6, %7 : vector<128x128xi32>
    %9 = arith.extui %8 : vector<128x128xi1> to vector<128x128xi32>
    %10 = arith.sitofp %9 : vector<128x128xi32> to vector<128x128xf32>
    %11 = arith.mulf %3, %10 : vector<128x128xf32>
    %cst_7 = arith.constant dense<0.000000e+00> : vector<128xf32>
    %12 = vector.multi_reduction <add>, %11, %cst_7 [1] : vector<128x128xf32> to vector<128xf32>
    %13 = vector.shape_cast %12 : vector<128xf32> to vector<128x1xf32>
    %cst_8 = arith.constant dense<0.000000e+00> : vector<128xf32>
    %14 = vector.multi_reduction <add>, %3, %cst_8 [1] : vector<128x128xf32> to vector<128xf32>
    %15 = vector.shape_cast %14 : vector<128xf32> to vector<128x1xf32>
    %16 = math.log %15 : vector<128x1xf32>
    %17 = math.log %13 : vector<128x1xf32>
    %18 = arith.subf %16, %17 : vector<128x1xf32>
    %c0_9 = arith.constant 0 : index
    %c0_10 = arith.constant 0 : index
    %19 = vector.load %arg5[%c0_9, %c0_10] : memref<128x1xf32, #tpu.memory_space<vmem>>, vector<128x1xf32>
    tpu.vector_store %arg5[%c0_9, %c0_10], %18 {strides = array<i32>} : memref<128x1xf32, #tpu.memory_space<vmem>>, vector<128x1xf32>,
    return
  }
  func.func @transform_0(%arg0: i32) -> (i32, i32) {
    %c0_i32 = arith.constant 0 : i32
    %c0_i32_0 = arith.constant 0 : i32
    %c0_i32_1 = arith.constant 0 : i32
    return %c0_i32, %c0_i32_0 : i32, i32
  }
  func.func @transform_1(%arg0: i32) -> (i32, i32) {
    %c0_i32 = arith.constant 0 : i32
    %c0_i32_0 = arith.constant 0 : i32
    %c0_i32_1 = arith.constant 0 : i32
    return %c0_i32, %c0_i32_0 : i32, i32
  }
  func.func @transform_2(%arg0: i32) -> (i32, i32) {
    %c0_i32 = arith.constant 0 : i32
    %c0_i32_0 = arith.constant 0 : i32
    %c0_i32_1 = arith.constant 0 : i32
    return %c0_i32, %c0_i32_0 : i32, i32
  }
  func.func @transform_3(%arg0: i32) -> (i32, i32) {
    %c0_i32 = arith.constant 0 : i32
    %c0_i32_0 = arith.constant 0 : i32
    %c0_i32_1 = arith.constant 0 : i32
    return %c0_i32, %c0_i32_0 : i32, i32
  }
  func.func @transform_4(%arg0: i32) -> (i32, i32) {
    %c0_i32 = arith.constant 0 : i32
    %c0_i32_0 = arith.constant 0 : i32
    %c0_i32_1 = arith.constant 0 : i32
    return %c0_i32, %c0_i32_0 : i32, i32
  }
}

</mosaic_0001>

<bundles_post_ra>
// kernel: tpu_custom_call.1
= control target key start
LH: loop header
LB: loop body
LE: loop exit
PB: predicated region body
PF: predicated region fallthrough
CT: control target
= control target key end

     0   :  { %v736_v1 = vmov 0   ;;  %vm98_vm0 = vcmask 392192   ;;  %v737_v47 = vmov 0.0   ;;  %s968_s1 = inlined_call_operand.vmem [shape: bf16[48,128], index: 1, kind: input, shape index: {}]   ;;  %s969_s0 = inlined_call_operand.vmem [shape: bf16[128,48], index: 0, kind: input, shape index: {}]   ;;  %s970_s2 = inlined_call_operand.vmem [shape: s32[128,1], index: 2, kind: input, shape index: {}]   ;;  %s971_s3 = inlined_call_operand.vmem [shape: s32[1,128], index: 3, kind: input, shape index: {}]   ;;  %s972_s4 = inlined_call_operand.vmem [shape: f32[128,1], index: 4, kind: output, shape index: {}]  }
   0x1   :  { %v629_v0 = vld [vmem:[%s968_s1 + $0x10] sm:$0xff]   ;;  %627 = vset.pattern.permute.xlu0 %v736_v1  ;;  %628 = vset.pattern.permute.xlu1 %v736_v1  ;;  %v630_v2 = vld [vmem:[%s968_s1 + $0x8] sm:$0xff]   ;;  %v631_v3 = vld [vmem:[%s968_s1] sm:$0xff]  }
   0x2   :  { %597 = vmatprep.subr.bf16.mxu0 %v629_v0  ;;  %619 = vmatprep.subr.bf16.mxu1 %v629_v0  ;;  %v632_v4 = vld [vmem:[%s969_s0] sm:$0xff]   ;;  %v634_v6 = vld [vmem:[%s969_s0 + $0x8] sm:$0xff]   ;;  %v636_v8 = vld [vmem:[%s969_s0 + $0x10] sm:$0xff]  }
   0x3   :  { %598 = vmatpush3.bf16.msra.mxu0 %v629_v0  ;;  %622 = vmatpush3.bf16.msra.mxu1 %v629_v0  ;;  %v633_v5 = vld [vmem:[%s969_s0 + $0x20] sm:$0xff]   ;;  %v635_v7 = vld [vmem:[%s969_s0 + $0x28] sm:$0xff]   ;;  %v637_v9 = vld [vmem:[%s969_s0 + $0x30] sm:$0xff]  }
   0x4   :  { %599 = vmatprep.subr.bf16.mxu0 %v630_v2  ;;  %620 = vmatprep.subr.bf16.mxu1 %v630_v2  ;;  %v252_v10 = vld [vmem:[%s970_s2] sm:$0xff]  ;;  %v254_v11 = vld [vmem:[%s970_s2 + $0x10] sm:$0xff]  ;;  %v253_v12 = vld [vmem:[%s970_s2 + $0x8] sm:$0xff] }
   0x5   :  { %603 = vmatprep.mubr.msk.bf16.mxu0 %vm98_vm0, %v632_v4  ;;  %611 = vmatprep.mubr.msk.bf16.mxu1 %vm98_vm0, %v633_v5  ;;  %v255_v13 = vld [vmem:[%s970_s2 + $0x18] sm:$0xff]  ;;  %v256_v14 = vld [vmem:[%s970_s2 + $0x20] sm:$0xff]  ;;  %v257_v15 = vld [vmem:[%s970_s2 + $0x28] sm:$0xff] }
   0x6   :  { %270 = vperm.xlu0 %627, %v252_v10   ;;  %276 = vperm.xlu1 %628, %v254_v11   ;;  %v638_v16 = vld [vmem:[%s969_s0 + $0x18] sm:$0xff]   ;;  %v258_v18 = vld [vmem:[%s970_s2 + $0x30] sm:$0xff]  ;;  %v260_v20 = vld [vmem:[%s970_s2 + $0x40] sm:$0xff] }
   0x7   :  { %600 = vmatpush3.bf16.msra.mxu0 %v630_v2  ;;  %623 = vmatpush3.bf16.msra.mxu1 %v630_v2  ;;  %v639_v17 = vld [vmem:[%s969_s0 + $0x38] sm:$0xff]   ;;  %v261_v21 = vld [vmem:[%s970_s2 + $0x48] sm:$0xff]  ;;  %v262_v22 = vld [vmem:[%s970_s2 + $0x50] sm:$0xff] }
   0x8   :  { %601 = vmatprep.subr.bf16.mxu0 %v631_v3  ;;  %621 = vmatprep.subr.bf16.mxu1 %v631_v3  ;;  %v259_v19 = vld [vmem:[%s970_s2 + $0x38] sm:$0xff]  ;;  %v264_v24 = vld [vmem:[%s970_s2 + $0x60] sm:$0xff]  ;;  %v265_v25 = vld [vmem:[%s970_s2 + $0x68] sm:$0xff] }
   0x9   :  { %v263_v23 = vld [vmem:[%s970_s2 + $0x58] sm:$0xff]  ;;  %v266_v26 = vld [vmem:[%s970_s2 + $0x70] sm:$0xff]  ;;  %v861_v43 = vld [vmem:[%s971_s3] ss:$0 sm:$0xff] }
   0xa   :  { %273 = vperm.xlu0 %627, %v253_v12   ;;  %279 = vperm.xlu1 %628, %v255_v13   ;;  %v267_v27 = vld [vmem:[%s970_s2 + $0x78] sm:$0xff] }
   0xb   :  { %602 = vmatpush3.bf16.msra.mxu0 %v631_v3  ;;  %624 = vmatpush3.bf16.msra.mxu1 %v631_v3 }
   0xe   :  { %604 = vmatmul.mubr.msk.bf16.vlgmr.msra.gmra.mxu0 %vm98_vm0, %v634_v6  ;;  %612 = vmatmul.mubr.msk.bf16.vlgmr.msra.gmra.mxu1 %vm98_vm0, %v635_v7 }
   0xf   :  { %607 = vmatprep.mubr.msk.bf16.mxu0 %vm98_vm0, %v636_v8  ;;  %615 = vmatprep.mubr.msk.bf16.mxu1 %vm98_vm0, %v637_v9 }
  0x10   :  { %282 = vperm.xlu0 %627, %v256_v14   ;;  %285 = vperm.xlu1 %628, %v257_v15  }
  0x14   :  { %288 = vperm.xlu0 %627, %v258_v18   ;;  %291 = vperm.xlu1 %628, %v259_v19  }
  0x16   :  { %608 = vmatmul.mubr.msk.bf16.gmra.mxu0 %vm98_vm0, %v638_v16  ;;  %616 = vmatmul.mubr.msk.bf16.gmra.mxu1 %vm98_vm0, %v639_v17 }
  0x18   :  { %294 = vperm.xlu0 %627, %v260_v20   ;;  %297 = vperm.xlu1 %628, %v261_v21  }
  0x1c   :  { %300 = vperm.xlu0 %627, %v262_v22   ;;  %303 = vperm.xlu1 %628, %v263_v23  }
  0x20   :  { %306 = vperm.xlu0 %627, %v264_v24   ;;  %309 = vperm.xlu1 %628, %v265_v25  }
  0x24   :  { %312 = vperm.xlu0 %627, %v266_v26   ;;  %315 = vperm.xlu1 %628, %v267_v27  }
  0x81   :  { %v271_v28 = vpop.permute.xlu0 %270  ;;  %v277_v34 = vpop.permute.xlu1 %276 }
  0x82   :  { %vm323_vm1 = vcmp.eq.s32.totalorder %v277_v34, %v861_v43  ;;  %vm321_vm2 = vcmp.eq.s32.totalorder %v271_v28, %v861_v43 }
  0x83   :  { %v572_v48 = vsel %vm323_vm1, 1.0, %v737_v47  ;;  %v570_v58 = vsel %vm321_vm2, 1.0, %v737_v47  ;;  %vm529_vm1 = vcmask 7168  }
  0x85   :  { %v852_v29 = vpop.permute.xlu0 %273  ;;  %v280_v41 = vpop.permute.xlu1 %279 }
  0x86   :  { %vm324_vm4 = vcmp.eq.s32.totalorder %v280_v41, %v861_v43  ;;  %vm322_vm7 = vcmp.eq.s32.totalorder %v852_v29, %v861_v43 }
  0x87   :  { %v573_v10 = vsel %vm324_vm4, 1.0, %v737_v47  ;;  %v571_v21 = vsel %vm322_vm7, 1.0, %v737_v47 }
  0x8b   :  { %v854_v30 = vpop.permute.xlu0 %282  ;;  %v865_v49 = vpop.permute.xlu1 %285 }
  0x8c   :  { %vm325_vm13 = vcmp.eq.s32.totalorder %v854_v30, %v861_v43  ;;  %vm326_vm15 = vcmp.eq.s32.totalorder %v865_v49, %v861_v43 }
  0x8f   :  { %v856_v38 = vpop.permute.xlu0 %288  ;;  %v870_v59 = vpop.permute.xlu1 %291 }
  0x90   :  { %vm327_vm8 = vcmp.eq.s32.totalorder %v856_v38, %v861_v43  ;;  %vm328_vm11 = vcmp.eq.s32.totalorder %v870_v59, %v861_v43 }
  0x93   :  { %v295_v45 = vpop.permute.xlu0 %294  ;;  %v298_v2 = vpop.permute.xlu1 %297 }
  0x94   :  { %vm329_vm5 = vcmp.eq.s32.totalorder %v295_v45, %v861_v43  ;;  %vm330_vm9 = vcmp.eq.s32.totalorder %v298_v2, %v861_v43 }
  0x95   :  { %v578_v13 = vsel %vm329_vm5, 1.0, %v737_v47 }
  0x97   :  { %v301_v55 = vpop.permute.xlu0 %300  ;;  %v304_v11 = vpop.permute.xlu1 %303 }
  0x98   :  { %vm331_vm3 = vcmp.eq.s32.totalorder %v301_v55, %v861_v43  ;;  %vm332_vm6 = vcmp.eq.s32.totalorder %v304_v11, %v861_v43 }
  0x99   :  { %v580_v61 = vsel %vm331_vm3, 1.0, %v737_v47  ;;  %v581_v18 = vsel %vm332_vm6, 1.0, %v737_v47 }
  0x9b   :  { %v307_v22 = vpop.permute.xlu0 %306 }
  0x9c   :  { %vm333_vm14 = vcmp.eq.s32.totalorder %v307_v22, %v861_v43 }
  0x9d   :  { %v582_v59 = vsel %vm333_vm14, 1.0, %v737_v47 }
  0x9f   :  { %v313_v29 = vpop.permute.xlu0 %312 }
  0xa0   :  { %vm335_vm10 = vcmp.eq.s32.totalorder %v313_v29, %v861_v43 }
  0xce   :  { %v605_v31 = vpop.f32.mrf.mxu0  ;;  %v613_v32 = vpop.f32.mrf.mxu1 }
  0xcf   :  { %v224_v33 = vmul.f32 1.442695, %v605_v31  ;;  %v240_v36 = vmul.f32 1.442695, %v613_v32  ;;  %v576_v32 = vsel %vm327_vm8, 1.0, %v737_v47 }
  0xd0   :  { %v157_v35 = vpop.f32.mrf.mxu0  ;;  %v189_v39 = vpop.f32.mrf.mxu1 }
  0xd1   :  { %640 = vpow2.f32 %v224_v33  ;;  %v220_v37 = vmul.f32 1.442695, %v157_v35  ;;  %v236_v50 = vmul.f32 1.442695, %v189_v39 }
  0xd2   :  { %v606_v40 = vpop.f32.mrf.mxu0  ;;  %v614_v44 = vpop.f32.mrf.mxu1 }
  0xd3   :  { %642 = vpow2.f32 %v220_v37  ;;  %v226_v42 = vmul.f32 1.442695, %v606_v40  ;;  %v242_v46 = vmul.f32 1.442695, %v614_v44  ;;  %v310_v37 = vpop.permute.xlu1 %309  ;;  %v584_v40 = vsel %vm335_vm10, 1.0, %v737_v47 }
  0xd4   :  { %644 = vpow2.f32 %v240_v36  ;;  %v160_v52 = vpop.f32.mrf.mxu0  ;;  %v192_v63 = vpop.f32.mrf.mxu1  ;;  %v579_v36 = vsel %vm330_vm9, 1.0, %v737_v47  ;;  %vm334_vm0 = vcmp.eq.s32.totalorder %v310_v37, %v861_v43 }
  0xd5   :  { %646 = vpow2.f32 %v226_v42  ;;  %v222_v56 = vmul.f32 1.442695, %v160_v52  ;;  %v238_v5 = vmul.f32 1.442695, %v192_v63  ;;  %v583_v63 = vsel %vm334_vm0, 1.0, %v737_v47 }
  0xd6   :  { %648 = vpow2.f32 %v242_v46  ;;  %v609_v0 = vpop.f32.mrf.mxu0  ;;  %v617_v4 = vpop.f32.mrf.mxu1 }
  0xd7   :  { %650 = vpow2.f32 %v236_v50  ;;  %v232_v3 = vmul.f32 1.442695, %v609_v0  ;;  %v248_v8 = vmul.f32 1.442695, %v617_v4  ;;  %v316_v46 = vpop.permute.xlu1 %315  ;;  %v577_v50 = vsel %vm328_vm11, 1.0, %v737_v47 }
  0xd8   :  { %652 = vpow2.f32 %v222_v56  ;;  %v173_v7 = vpop.f32.mrf.mxu0  ;;  %v205_v14 = vpop.f32.mrf.mxu1  ;;  %vm336_vm12 = vcmp.eq.s32.totalorder %v316_v46, %v861_v43  ;;  %v574_v56 = vsel %vm325_vm13, 1.0, %v737_v47 }
  0xd9   :  { %654 = vpow2.f32 %v232_v3  ;;  %v228_v24 = vmul.f32 1.442695, %v173_v7  ;;  %v244_v27 = vmul.f32 1.442695, %v205_v14 }
  0xda   :  { %656 = vpow2.f32 %v238_v5  ;;  %v610_v15 = vpop.f32.mrf.mxu0  ;;  %v618_v23 = vpop.f32.mrf.mxu1 }
  0xdb   :  { %658 = vpow2.f32 %v248_v8  ;;  %v234_v19 = vmul.f32 1.442695, %v610_v15  ;;  %v250_v26 = vmul.f32 1.442695, %v618_v23 }
  0xdc   :  { %v176_v33 = vpop.f32.mrf.mxu0  ;;  %v208_v41 = vpop.f32.mrf.mxu1 }
  0xdd   :  { %660 = vpow2.f32 %v234_v19  ;;  %v230_v38 = vmul.f32 1.442695, %v176_v33  ;;  %v246_v44 = vmul.f32 1.442695, %v208_v41 }
  0xde   :  { %v641_v51 = vpop.eup %640  ;;  %662 = vpow2.f32 %v228_v24 }
  0xdf   :  { %421 = vadd.xlane.f32.xlu1 %v641_v51  ;;  %v371_v53 = vmul.f32 %v641_v51, %v572_v48  ;;  %664 = vpow2.f32 %v250_v26 }
  0xe0   :  { %v643_v54 = vpop.eup %642  ;;  %666 = vpow2.f32 %v244_v27 }
  0xe1   :  { %389 = vadd.xlane.f32.xlu0 %v371_v53  ;;  %v645_v57 = vpop.eup %644  ;;  %v369_v60 = vmul.f32 %v643_v54, %v570_v58  ;;  %668 = vpow2.f32 %v230_v38 }
  0xe2   :  { %v379_v62 = vmul.f32 %v645_v57, %v580_v61  ;;  %v647_v1 = vpop.eup %646  ;;  %670 = vpow2.f32 %v246_v44  ;;  %v575_v61 = vsel %vm326_vm15, 1.0, %v737_v47 }
  0xe3   :  { %437 = vadd.xlane.f32.xlu1 %v645_v57  ;;  %v649_v6 = vpop.eup %648  ;;  %v372_v12 = vmul.f32 %v647_v1, %v573_v10 }
  0xe4   :  { %v651_v9 = vpop.eup %650  ;;  %v380_v20 = vmul.f32 %v649_v6, %v581_v18 }
  0xe5   :  { %385 = vadd.xlane.f32.xlu0 %v369_v60  ;;  %v377_v16 = vmul.f32 %v651_v9, %v578_v13  ;;  %v653_v17 = vpop.eup %652 }
  0xe6   :  { %v370_v25 = vmul.f32 %v653_v17, %v571_v21  ;;  %v655_v28 = vpop.eup %654 }
  0xe7   :  { %405 = vadd.xlane.f32.xlu1 %v379_v62  ;;  %v657_v31 = vpop.eup %656  ;;  %v375_v34 = vmul.f32 %v655_v28, %v576_v32 }
  0xe8   :  { %v659_v35 = vpop.eup %658  ;;  %v378_v39 = vmul.f32 %v657_v31, %v579_v36 }
  0xe9   :  { %423 = vadd.xlane.f32.xlu0 %v647_v1  ;;  %v383_v42 = vmul.f32 %v659_v35, %v584_v40 }
  0xea   :  { %v661_v45 = vpop.eup %660 }
  0xeb   :  { %417 = vadd.xlane.f32.xlu1 %v643_v54  ;;  %v663_v48 = vpop.eup %662  ;;  %v376_v51 = vmul.f32 %v661_v45, %v577_v50  ;;  %v585_v54 = vsel %vm336_vm12, 1.0, %v737_v47 }
  0xec   :  { %v665_v52 = vpop.eup %664  ;;  %v373_v57 = vmul.f32 %v663_v48, %v574_v56 }
  0xed   :  { %439 = vadd.xlane.f32.xlu0 %v649_v6  ;;  %v667_v53 = vpop.eup %666  ;;  %v384_v55 = vmul.f32 %v665_v52, %v585_v54 }
  0xee   :  { %v669_v58 = vpop.eup %668  ;;  %v381_v60 = vmul.f32 %v667_v53, %v582_v59 }
  0xef   :  { %433 = vadd.xlane.f32.xlu1 %v651_v9  ;;  %v671_v30 = vpop.eup %670  ;;  %v374_v62 = vmul.f32 %v669_v58, %v575_v61 }
  0xf0   :  { %v382_v0 = vmul.f32 %v671_v30, %v583_v63 }
  0xf1   :  { %391 = vadd.xlane.f32.xlu0 %v372_v12 }
  0xf3   :  { %401 = vadd.xlane.f32.xlu1 %v377_v16 }
  0xf5   :  { %407 = vadd.xlane.f32.xlu0 %v380_v20 }
  0xf7   :  { %387 = vadd.xlane.f32.xlu1 %v370_v25 }
  0xf9   :  { %419 = vadd.xlane.f32.xlu0 %v653_v17 }
  0xfb   :  { %429 = vadd.xlane.f32.xlu1 %v655_v28 }
  0xfd   :  { %435 = vadd.xlane.f32.xlu0 %v657_v31 }
  0xff   :  { %397 = vadd.xlane.f32.xlu1 %v375_v34 }
 0x101   :  { %403 = vadd.xlane.f32.xlu0 %v378_v39 }
 0x103   :  { %413 = vadd.xlane.f32.xlu1 %v383_v42 }
 0x105   :  { %431 = vadd.xlane.f32.xlu0 %v661_v45 }
 0x107   :  { %425 = vadd.xlane.f32.xlu1 %v663_v48 }
 0x109   :  { %399 = vadd.xlane.f32.xlu0 %v376_v51 }
 0x10b   :  { %441 = vadd.xlane.f32.xlu1 %v667_v53 }
 0x10d   :  { %415 = vadd.xlane.f32.xlu0 %v384_v55 }
 0x10f   :  { %393 = vadd.xlane.f32.xlu1 %v373_v57 }
 0x111   :  { %427 = vadd.xlane.f32.xlu0 %v669_v58 }
 0x113   :  { %409 = vadd.xlane.f32.xlu1 %v381_v60 }
 0x115   :  { %443 = vadd.xlane.f32.xlu0 %v671_v30 }
 0x117   :  { %445 = vadd.xlane.f32.xlu1 %v659_v35 }
 0x119   :  { %395 = vadd.xlane.f32.xlu0 %v374_v62 }
 0x11d   :  { %411 = vadd.xlane.f32.xlu0 %v382_v0 }
 0x121   :  { %447 = vadd.xlane.f32.xlu0 %v665_v52 }
 0x168   :  { %v422_v1 = vpop.xlane.xlu1 %421 }
 0x169   :  { %672 = vlog2.f32 %v422_v1 }
 0x16a   :  { %v390_v2 = vpop.xlane.xlu0 %389 }
 0x16b   :  { %674 = vlog2.f32 %v390_v2 }
 0x16c   :  { %v438_v49 = vpop.xlane.xlu1 %437 }
 0x16d   :  { %676 = vlog2.f32 %v438_v49 }
 0x16e   :  { %v386_v3 = vpop.xlane.xlu0 %385 }
 0x170   :  { %v406_v4 = vpop.xlane.xlu1 %405 }
 0x171   :  { %678 = vlog2.f32 %v406_v4 }
 0x172   :  { %v424_v5 = vpop.xlane.xlu0 %423  ;;  %680 = vlog2.f32 %v386_v3 }
 0x174   :  { %v418_v43 = vpop.xlane.xlu1 %417 }
 0x175   :  { %682 = vlog2.f32 %v418_v43 }
 0x176   :  { %v673_v6 = vpop.eup %672  ;;  %v440_v7 = vpop.xlane.xlu0 %439  ;;  %684 = vlog2.f32 %v424_v5 }
 0x177   :  { %v454_v9 = vmul.f32 0.6931472, %v673_v6 }
 0x178   :  { %v675_v8 = vpop.eup %674  ;;  %v434_v47 = vpop.xlane.xlu1 %433 }
 0x179   :  { %v486_v10 = vmul.f32 0.6931472, %v675_v8  ;;  %686 = vlog2.f32 %v434_v47 }
 0x17a   :  { %v677_v11 = vpop.eup %676  ;;  %v392_v12 = vpop.xlane.xlu0 %391 }
 0x17b   :  { %v515_v13 = vsub.f32 %v454_v9, %v486_v10  ;;  %688 = vlog2.f32 %v392_v12  ;;  %v470_v15 = vmul.f32 0.6931472, %v677_v11 }
 0x17c   :  { %690 = vlog2.f32 %v440_v7  ;;  %v402_v14 = vpop.xlane.xlu1 %401 }
 0x17d   :  { %532 = vst.msk [vmem:[%s972_s4 + $0x10] sm:$0xff] %vm529_vm1, %v515_v13  ;;  %692 = vlog2.f32 %v402_v14 }
 0x17e   :  { %v679_v16 = vpop.eup %678  ;;  %v408_v17 = vpop.xlane.xlu0 %407 }
 0x17f   :  { %v502_v18 = vmul.f32 0.6931472, %v679_v16  ;;  %694 = vlog2.f32 %v408_v17  ;;  %v681_v19 = vpop.eup %680 }
 0x180   :  { %v388_v20 = vpop.xlane.xlu1 %387  ;;  %v482_v24 = vmul.f32 0.6931472, %v681_v19 }
 0x181   :  { %v523_v21 = vsub.f32 %v470_v15, %v502_v18  ;;  %696 = vlog2.f32 %v388_v20 }
 0x182   :  { %v683_v22 = vpop.eup %682  ;;  %v420_v23 = vpop.xlane.xlu0 %419 }
 0x183   :  { %540 = vst.msk [vmem:[%s972_s4 + $0x50] sm:$0xff] %vm529_vm1, %v523_v21  ;;  %v450_v25 = vmul.f32 0.6931472, %v683_v22  ;;  %698 = vlog2.f32 %v420_v23  ;;  %v685_v28 = vpop.eup %684 }
 0x184   :  { %v430_v26 = vpop.xlane.xlu1 %429  ;;  %v456_v35 = vmul.f32 0.6931472, %v685_v28 }
 0x185   :  { %v513_v27 = vsub.f32 %v450_v25, %v482_v24  ;;  %700 = vlog2.f32 %v430_v26 }
 0x186   :  { %v436_v29 = vpop.xlane.xlu0 %435  ;;  %v687_v31 = vpop.eup %686 }
 0x187   :  { %530 = vst.msk [vmem:[%s972_s4] sm:$0xff] %vm529_vm1, %v513_v27  ;;  %702 = vlog2.f32 %v436_v29  ;;  %v466_v39 = vmul.f32 0.6931472, %v687_v31 }
 0x188   :  { %v689_v32 = vpop.eup %688  ;;  %v398_v33 = vpop.xlane.xlu1 %397 }
 0x189   :  { %v691_v34 = vpop.eup %690  ;;  %v488_v36 = vmul.f32 0.6931472, %v689_v32  ;;  %704 = vlog2.f32 %v398_v33 }
 0x18a   :  { %v693_v37 = vpop.eup %692  ;;  %v404_v38 = vpop.xlane.xlu0 %403  ;;  %v472_v45 = vmul.f32 0.6931472, %v691_v34 }
 0x18b   :  { %v516_v40 = vsub.f32 %v456_v35, %v488_v36  ;;  %v498_v41 = vmul.f32 0.6931472, %v693_v37  ;;  %706 = vlog2.f32 %v404_v38 }
 0x18c   :  { %v695_v42 = vpop.eup %694  ;;  %v414_v44 = vpop.xlane.xlu1 %413 }
 0x18d   :  { %533 = vst.msk [vmem:[%s972_s4 + $0x18] sm:$0xff] %vm529_vm1, %v516_v40  ;;  %v521_v46 = vsub.f32 %v466_v39, %v498_v41  ;;  %v504_v48 = vmul.f32 0.6931472, %v695_v42 }
 0x18e   :  { %v697_v50 = vpop.eup %696  ;;  %v432_v51 = vpop.xlane.xlu0 %431 }
 0x18f   :  { %538 = vst.msk [vmem:[%s972_s4 + $0x40] sm:$0xff] %vm529_vm1, %v521_v46  ;;  %v524_v52 = vsub.f32 %v472_v45, %v504_v48  ;;  %v484_v55 = vmul.f32 0.6931472, %v697_v50  ;;  %708 = vlog2.f32 %v432_v51 }
 0x190   :  { %v699_v53 = vpop.eup %698  ;;  %v426_v54 = vpop.xlane.xlu1 %425 }
 0x191   :  { %541 = vst.msk [vmem:[%s972_s4 + $0x58] sm:$0xff] %vm529_vm1, %v524_v52  ;;  %v452_v56 = vmul.f32 0.6931472, %v699_v53 }
 0x192   :  { %v701_v57 = vpop.eup %700  ;;  %v400_v58 = vpop.xlane.xlu0 %399 }
 0x193   :  { %v514_v59 = vsub.f32 %v452_v56, %v484_v55  ;;  %710 = vlog2.f32 %v400_v58  ;;  %v462_v61 = vmul.f32 0.6931472, %v701_v57 }
 0x194   :  { %v442_v60 = vpop.xlane.xlu1 %441  ;;  %v703_v30 = vpop.eup %702  ;;  %712 = vlog2.f32 %v426_v54 }
 0x195   :  { %531 = vst.msk [vmem:[%s972_s4 + $0x8] sm:$0xff] %vm529_vm1, %v514_v59  ;;  %v468_v49 = vmul.f32 0.6931472, %v703_v30 }
 0x196   :  { %v705_v62 = vpop.eup %704  ;;  %v416_v63 = vpop.xlane.xlu0 %415 }
 0x197   :  { %v494_v0 = vmul.f32 0.6931472, %v705_v62 }
 0x198   :  { %v707_v1 = vpop.eup %706  ;;  %v394_v2 = vpop.xlane.xlu1 %393 }
 0x199   :  { %v519_v3 = vsub.f32 %v462_v61, %v494_v0  ;;  %v500_v4 = vmul.f32 0.6931472, %v707_v1  ;;  %714 = vlog2.f32 %v394_v2 }
 0x19a   :  { %v428_v5 = vpop.xlane.xlu0 %427  ;;  %716 = vlog2.f32 %v442_v60 }
 0x19b   :  { %536 = vst.msk [vmem:[%s972_s4 + $0x30] sm:$0xff] %vm529_vm1, %v519_v3  ;;  %v522_v43 = vsub.f32 %v468_v49, %v500_v4 }
 0x19c   :  { %v410_v6 = vpop.xlane.xlu1 %409  ;;  %v709_v7 = vpop.eup %708 }
 0x19d   :  { %539 = vst.msk [vmem:[%s972_s4 + $0x48] sm:$0xff] %vm529_vm1, %v522_v43  ;;  %718 = vlog2.f32 %v410_v6  ;;  %v464_v10 = vmul.f32 0.6931472, %v709_v7 }
 0x19e   :  { %v444_v8 = vpop.xlane.xlu0 %443  ;;  %720 = vlog2.f32 %v414_v44 }
 0x19f   :  { %722 = vlog2.f32 %v428_v5 }
 0x1a0   :  { %v711_v47 = vpop.eup %710  ;;  %v446_v9 = vpop.xlane.xlu1 %445 }
 0x1a1   :  { %v496_v11 = vmul.f32 0.6931472, %v711_v47  ;;  %724 = vlog2.f32 %v446_v9  ;;  %v713_v14 = vpop.eup %712 }
 0x1a2   :  { %v396_v12 = vpop.xlane.xlu0 %395  ;;  %v458_v17 = vmul.f32 0.6931472, %v713_v14 }
 0x1a3   :  { %v520_v13 = vsub.f32 %v464_v10, %v496_v11  ;;  %726 = vlog2.f32 %v396_v12 }
 0x1a4   :  { %728 = vlog2.f32 %v444_v8 }
 0x1a5   :  { %537 = vst.msk [vmem:[%s972_s4 + $0x38] sm:$0xff] %vm529_vm1, %v520_v13 }
 0x1a6   :  { %v715_v15 = vpop.eup %714  ;;  %v412_v16 = vpop.xlane.xlu0 %411 }
 0x1a7   :  { %v490_v18 = vmul.f32 0.6931472, %v715_v15  ;;  %730 = vlog2.f32 %v412_v16  ;;  %v717_v19 = vpop.eup %716 }
 0x1a8   :  { %732 = vlog2.f32 %v416_v63  ;;  %v474_v23 = vmul.f32 0.6931472, %v717_v19 }
 0x1a9   :  { %v517_v20 = vsub.f32 %v458_v17, %v490_v18 }
 0x1aa   :  { %v719_v21 = vpop.eup %718  ;;  %v448_v22 = vpop.xlane.xlu0 %447 }
 0x1ab   :  { %534 = vst.msk [vmem:[%s972_s4 + $0x20] sm:$0xff] %vm529_vm1, %v517_v20  ;;  %v506_v24 = vmul.f32 0.6931472, %v719_v21  ;;  %734 = vlog2.f32 %v448_v22  ;;  %v721_v25 = vpop.eup %720 }
 0x1ac   :  { %v723_v26 = vpop.eup %722  ;;  %v510_v29 = vmul.f32 0.6931472, %v721_v25 }
 0x1ad   :  { %v525_v27 = vsub.f32 %v474_v23, %v506_v24  ;;  %v460_v33 = vmul.f32 0.6931472, %v723_v26 }
 0x1ae   :  { %v725_v28 = vpop.eup %724 }
 0x1af   :  { %542 = vst.msk [vmem:[%s972_s4 + $0x60] sm:$0xff] %vm529_vm1, %v525_v27  ;;  %v478_v31 = vmul.f32 0.6931472, %v725_v28 }
 0x1b0   :  { %v727_v32 = vpop.eup %726 }
 0x1b1   :  { %v527_v34 = vsub.f32 %v478_v31, %v510_v29  ;;  %v492_v35 = vmul.f32 0.6931472, %v727_v32  ;;  %v729_v36 = vpop.eup %728 }
 0x1b2   :  { %v476_v39 = vmul.f32 0.6931472, %v729_v36 }
 0x1b3   :  { %544 = vst.msk [vmem:[%s972_s4 + $0x70] sm:$0xff] %vm529_vm1, %v527_v34  ;;  %v518_v37 = vsub.f32 %v460_v33, %v492_v35 }
 0x1b4   :  { %v731_v38 = vpop.eup %730 }
 0x1b5   :  { %535 = vst.msk [vmem:[%s972_s4 + $0x28] sm:$0xff] %vm529_vm1, %v518_v37  ;;  %v508_v40 = vmul.f32 0.6931472, %v731_v38  ;;  %v733_v41 = vpop.eup %732 }
 0x1b6   :  { %v512_v45 = vmul.f32 0.6931472, %v733_v41 }
 0x1b7   :  { %v526_v42 = vsub.f32 %v476_v39, %v508_v40 }
 0x1b8   :  { %v735_v44 = vpop.eup %734 }
 0x1b9   :  { %543 = vst.msk [vmem:[%s972_s4 + $0x68] sm:$0xff] %vm529_vm1, %v526_v42  ;;  %v480_v46 = vmul.f32 0.6931472, %v735_v44 }
 0x1bb   :  { %v528_v48 = vsub.f32 %v480_v46, %v512_v45 }
 0x1bd   :  { %545 = vst.msk [vmem:[%s972_s4 + $0x78] sm:$0xff] %vm529_vm1, %v528_v48 }

</bundles_post_ra>
